<compile_context>
chip_gen: v7x
topology: tpu7x:2x2x1
jax: 0.10.0
libtpu: 0.0.40
codegen_flags: <defaults>
</compile_context>

<pallas_src>
import math
import jax
import jax.numpy as jnp
from jax.experimental import pallas as pl
from jax.experimental.pallas import tpu as pltpu

LN_EPS = 1e-5                     # nn.LayerNorm default
COMPUTE_DTYPE = jnp.bfloat16      # MXU input dtype; accumulation stays f32


def _layernorm(x, g, b):
    # x: (T, C) f32; g, b: (1, C) f32
    mu = jnp.mean(x, axis=-1, keepdims=True)
    xc = x - mu
    var = jnp.mean(xc * xc, axis=-1, keepdims=True)
    return xc * jax.lax.rsqrt(var + LN_EPS) * g + b


def _erf(x):
    # Abramowitz & Stegun 7.1.26 polynomial erf (f32-exact to ~1.5e-7), built only
    # from ops guaranteed to lower on Mosaic.
    a1, a2, a3, a4, a5 = 0.254829592, -0.284496736, 1.421413741, -1.453152027, 1.061405429
    p = 0.3275911
    s = jnp.where(x >= 0.0, 1.0, -1.0)
    ax = jnp.abs(x)
    t = 1.0 / (1.0 + p * ax)
    poly = ((((a5 * t + a4) * t + a3) * t + a2) * t + a1) * t
    return s * (1.0 - poly * jnp.exp(-ax * ax))


def _gelu_exact(x):
    # matches nn.GELU() (exact, erf-based)
    return 0.5 * x * (1.0 + _erf(x * (1.0 / math.sqrt(2.0))))


# ----------------------------------------------------------------------------------
# Kernel 1: LN1 + qkv projection, per (batch, query tile).
# Emits q (already scaled by head_dim^-0.5), k, v as (B, H, N, Dh) in compute dtype.
# ----------------------------------------------------------------------------------
def make_qkv_kernel(num_heads, head_dim, compute_dtype):
    H, Dh = num_heads, head_dim
    scale = head_dim ** -0.5

    def kernel(x_ref, ln1g_ref, ln1b_ref, wqkv_ref, bqkv_ref, q_ref, k_ref, v_ref):
        x = x_ref[0]                                              # (TQ, C) f32
        C = x.shape[-1]
        h = _layernorm(x, ln1g_ref[...], ln1b_ref[...])
        qkv = jnp.dot(h.astype(compute_dtype), wqkv_ref[...],
                      preferred_element_type=jnp.float32) + bqkv_ref[...]   # (TQ, 3C) f32
        # channel layout matches torch reshape (3, H, Dh): c = which*C + h*Dh + d
        for hi in range(H):
            q_ref[0, hi] = (qkv[:, hi * Dh:(hi + 1) * Dh] * scale).astype(q_ref.dtype)
            k_ref[0, hi] = qkv[:, C + hi * Dh: C + (hi + 1) * Dh].astype(k_ref.dtype)
            v_ref[0, hi] = qkv[:, 2 * C + hi * Dh: 2 * C + (hi + 1) * Dh].astype(v_ref.dtype)

    return kernel


# ----------------------------------------------------------------------------------
# Kernel 2: per (batch, query tile): retention (decay built in-kernel) + folded output
# projection + residual + LN2 + MLP + residual.
# ----------------------------------------------------------------------------------
def make_attn_mlp_kernel(num_heads, head_dim, tile_q, compute_dtype):
    H, Dh, TQ = num_heads, head_dim, tile_q

    def kernel(x_ref, q_ref, k_ref, v_ref, logg_ref,
               wout_ref, bout_ref, ln2g_ref, ln2b_ref,
               wfc1_ref, bfc1_ref, wfc2_ref, bfc2_ref, o_ref):
        qi = pl.program_id(1)
        x = x_ref[0]                                              # (TQ, C) f32
        C = x.shape[-1]
        Nk = k_ref.shape[2]

        # In-kernel retention decay (replaces the (H, N, N) HBM mask):
        #   D[h, i, j] = gamma_h^(i-j)  if i >= j else 0
        row = qi * TQ + jax.lax.broadcasted_iota(jnp.int32, (TQ, Nk), 0)
        col = jax.lax.broadcasted_iota(jnp.int32, (TQ, Nk), 1)
        diff = (row - col).astype(jnp.float32)
        causal = diff >= 0.0
        dpos = jnp.maximum(diff, 0.0)                             # keeps exp arg <= 0

        lg = logg_ref[...]                                        # (1, H) f32 log(gamma)

        # Folded output projection accumulator (bias added once up front).
        acc = jnp.zeros((TQ, C), jnp.float32) + bout_ref[...]
        for hi in range(H):
            qh = q_ref[0, hi]                                     # (TQ, Dh), pre-scaled
            kh = k_ref[0, hi]                                     # (Nk, Dh)
            vh = v_ref[0, hi]                                     # (Nk, Dh)
            s = jax.lax.dot_general(qh, kh, (((1,), (1,)), ((), ())),
                                    preferred_element_type=jnp.float32)      # (TQ, Nk)
            decay = jnp.where(causal, jnp.exp(dpos * lg[:, hi:hi + 1]), 0.0)
            s = s * decay
            s = s - jnp.max(s, axis=-1, keepdims=True)
            e = jnp.exp(s)
            p = e * pl.reciprocal(jnp.sum(e, axis=-1, keepdims=True), approx=True)
            ho = jnp.dot(p.astype(compute_dtype), vh,
                         preferred_element_type=jnp.float32)                  # (TQ, Dh)
            # fold out_proj: row block of W_out (sublane-aligned slice, no concat)
            acc = acc + jnp.dot(ho.astype(compute_dtype),
                                wout_ref[hi * Dh:(hi + 1) * Dh, :],
                                preferred_element_type=jnp.float32)
        x1 = x + acc                                              # ls1/drop_path1 = Identity

        # ---- norm2 + MLP ----
        h2 = _layernorm(x1, ln2g_ref[...], ln2b_ref[...])
        m = jnp.dot(h2.astype(compute_dtype), wfc1_ref[...],
                    preferred_element_type=jnp.float32) + bfc1_ref[...]
        m = _gelu_exact(m)
        m = jnp.dot(m.astype(compute_dtype), wfc2_ref[...],
                    preferred_element_type=jnp.float32) + bfc2_ref[...]
        o_ref[0] = (x1 + m).astype(o_ref.dtype)

    return kernel


def _pick_tile_q(N):
    for cand in (256, 128, 64, 32, 16, 8):
        if N % cand == 0:
            return cand
    return N


def _maybe_vmem_limit(per_step_bytes):
    default_limit = 32 * 1024 * 1024
    if per_step_bytes <= default_limit:
        return None   # toy / small shapes: default scoped limit is plenty
    # TODO(synk): on v7x (64 MiB physical VMEM) shrink tile_q instead of raising further.
    return min(int(per_step_bytes) + (4 << 20), 64 * 1024 * 1024)


def block_forward(x, gammas, params, compute_dtype=COMPUTE_DTYPE, tile_q=None):
    """x: (B, N, C) f32, gammas: (H,) f32 retention decay factors."""
    B, N, C = x.shape
    H = int(gammas.shape[0])
    assert C % H == 0
    Dh = C // H
    hidden = params["w_fc1"].shape[1]
    if tile_q is None:
        tile_q = _pick_tile_q(N)
    assert N % tile_q == 0
    NQ = N // tile_q
    cb = jnp.dtype(compute_dtype).itemsize

    # weights in compute dtype (halves weight HBM traffic / VMEM); biases & LN in f32
    w_qkv = params["w_qkv"].astype(compute_dtype)
    w_out = params["w_out"].astype(compute_dtype)
    w_fc1 = params["w_fc1"].astype(compute_dtype)
    w_fc2 = params["w_fc2"].astype(compute_dtype)
    ln1g = params["ln1_g"].reshape(1, C).astype(jnp.float32)
    ln1b = params["ln1_b"].reshape(1, C).astype(jnp.float32)
    ln2g = params["ln2_g"].reshape(1, C).astype(jnp.float32)
    ln2b = params["ln2_b"].reshape(1, C).astype(jnp.float32)
    b_qkv = params["b_qkv"].reshape(1, 3 * C).astype(jnp.float32)
    b_out = params["b_out"].reshape(1, C).astype(jnp.float32)
    b_fc1 = params["b_fc1"].reshape(1, hidden).astype(jnp.float32)
    b_fc2 = params["b_fc2"].reshape(1, C).astype(jnp.float32)
    log_g = jnp.log(gammas.astype(jnp.float32)).reshape(1, H)

    # ---------------- pass 1: LN1 + qkv projection ----------------
    qkv_bytes = (N * C * 4 + C * 3 * C * cb + 3 * N * Dh * H * cb) * B
    q, k, v = pl.pallas_call(
        make_qkv_kernel(H, Dh, compute_dtype),
        out_shape=(jax.ShapeDtypeStruct((B, H, N, Dh), compute_dtype),
                   jax.ShapeDtypeStruct((B, H, N, Dh), compute_dtype),
                   jax.ShapeDtypeStruct((B, H, N, Dh), compute_dtype)),
        grid_spec=pltpu.PrefetchScalarGridSpec(
            num_scalar_prefetch=0,
            grid=(B, NQ),
            in_specs=[
                pl.BlockSpec((1, tile_q, C), lambda b, qi: (b, qi, 0)),
                pl.BlockSpec((1, C), lambda b, qi: (0, 0)),
                pl.BlockSpec((1, C), lambda b, qi: (0, 0)),
                pl.BlockSpec((C, 3 * C), lambda b, qi: (0, 0)),
                pl.BlockSpec((1, 3 * C), lambda b, qi: (0, 0)),
            ],
            out_specs=[
                pl.BlockSpec((1, H, tile_q, Dh), lambda b, qi: (b, 0, qi, 0)),
                pl.BlockSpec((1, H, tile_q, Dh), lambda b, qi: (b, 0, qi, 0)),
                pl.BlockSpec((1, H, tile_q, Dh), lambda b, qi: (b, 0, qi, 0)),
            ],
        ),
        compiler_params=pltpu.CompilerParams(
            dimension_semantics=("parallel", "parallel")),
        cost_estimate=pl.CostEstimate(
            flops=2 * B * N * C * 3 * C,
            transcendentals=B * N,
            bytes_accessed=int(qkv_bytes)),
    )(x, ln1g, ln1b, w_qkv, b_qkv)

    # ---------------- pass 2: retention + out-proj + residual + MLP ----------------
    per_step = 2 * (                              # BlockSpec double-buffers each operand
        2 * tile_q * C * 4                        # x tile + out tile (f32)
        + H * tile_q * Dh * cb                    # q tile
        + 2 * H * N * Dh * cb                     # k, v (full keys)
        + (C * C + C * hidden + hidden * C) * cb  # weights
        + (6 * C + 2 * hidden + H) * 4            # biases / LN params / log-gammas
    ) + 3 * tile_q * N * 4 + 2 * tile_q * hidden * 4   # live scores/decay + MLP hidden
    attn_flops = B * (4 * H * N * N * Dh + 2 * N * C * C + 4 * N * C * hidden)
    attn_trans = B * (2 * H * N * N + N * hidden + N)
    attn_bytes = B * (2 * N * C * 4 + 3 * H * N * Dh * cb) + \
        (C * C + C * hidden + hidden * C) * cb

    out = pl.pallas_call(
        make_attn_mlp_kernel(H, Dh, tile_q, compute_dtype),
        out_shape=jax.ShapeDtypeStruct((B, N, C), x.dtype),
        grid_spec=pltpu.PrefetchScalarGridSpec(
            num_scalar_prefetch=0,
            grid=(B, NQ),
            in_specs=[
                pl.BlockSpec((1, tile_q, C), lambda b, qi: (b, qi, 0)),        # x
                pl.BlockSpec((1, H, tile_q, Dh), lambda b, qi: (b, 0, qi, 0)), # q
                pl.BlockSpec((1, H, N, Dh), lambda b, qi: (b, 0, 0, 0)),       # k
                pl.BlockSpec((1, H, N, Dh), lambda b, qi: (b, 0, 0, 0)),       # v
                pl.BlockSpec((1, H), lambda b, qi: (0, 0)),                    # log gammas
                pl.BlockSpec((C, C), lambda b, qi: (0, 0)),                    # w_out
                pl.BlockSpec((1, C), lambda b, qi: (0, 0)),                    # b_out
                pl.BlockSpec((1, C), lambda b, qi: (0, 0)),                    # ln2_g
                pl.BlockSpec((1, C), lambda b, qi: (0, 0)),                    # ln2_b
                pl.BlockSpec((C, hidden), lambda b, qi: (0, 0)),               # w_fc1
                pl.BlockSpec((1, hidden), lambda b, qi: (0, 0)),               # b_fc1
                pl.BlockSpec((hidden, C), lambda b, qi: (0, 0)),               # w_fc2
                pl.BlockSpec((1, C), lambda b, qi: (0, 0)),                    # b_fc2
            ],
            out_specs=pl.BlockSpec((1, tile_q, C), lambda b, qi: (b, qi, 0)),
        ),
        compiler_params=pltpu.CompilerParams(
            dimension_semantics=("parallel", "parallel"),
            vmem_limit_bytes=_maybe_vmem_limit(per_step)),
        cost_estimate=pl.CostEstimate(
            flops=int(attn_flops),
            transcendentals=int(attn_trans),
            bytes_accessed=int(attn_bytes)),
    )(x, q, k, v, log_g, w_out, b_out, ln2g, ln2b, w_fc1, b_fc1, w_fc2, b_fc2)
    return out


# ---------------- pure-JAX reference (matches the PyTorch module) ----------------
def block_ref(x, mask, params):
    B, N, C = x.shape
    H = mask.shape[0]
    Dh = C // H
    scale = Dh ** -0.5

    def ln(v, g, b):
        mu = jnp.mean(v, -1, keepdims=True)
        var = jnp.mean((v - mu) ** 2, -1, keepdims=True)
        return (v - mu) * jax.lax.rsqrt(var + LN_EPS) * g + b

    h = ln(x, params["ln1_g"], params["ln1_b"])
    qkv = h @ params["w_qkv"] + params["b_qkv"]
    qkv = qkv.reshape(B, N, 3, H, Dh).transpose(2, 0, 3, 1, 4)
    q, k, v = qkv[0] * scale, qkv[1], qkv[2]
    r = jnp.einsum("bhnd,bhmd->bhnm", q, k) * mask[None]
    r = jax.nn.softmax(r, axis=-1)
    att = jnp.einsum("bhnm,bhmd->bhnd", r, v).transpose(0, 2, 1, 3).reshape(B, N, C)
    att = att @ params["w_out"] + params["b_out"]
    x1 = x + att
    h2 = ln(x1, params["ln2_g"], params["ln2_b"])
    m = jax.nn.gelu(h2 @ params["w_fc1"] + params["b_fc1"], approximate=False)
    m = m @ params["w_fc2"] + params["b_fc2"]
    return x1 + m


if __name__ == "__main__":
    B, N, C, H = 2, 8, 32, 4          # batch, seq, dim, num_heads
    hidden = int(C * 4.0)             # mlp_ratio = 4
    key = jax.random.PRNGKey(0)
    keys = jax.random.split(key, 10)

    params = {
        "ln1_g": jnp.ones((C,), jnp.float32),
        "ln1_b": jnp.zeros((C,), jnp.float32),
        "w_qkv": 0.05 * jax.random.normal(keys[0], (C, 3 * C), jnp.float32),
        "b_qkv": 0.05 * jax.random.normal(keys[1], (3 * C,), jnp.float32),
        "w_out": 0.05 * jax.random.normal(keys[2], (C, C), jnp.float32),
        "b_out": 0.05 * jax.random.normal(keys[3], (C,), jnp.float32),
        "ln2_g": jnp.ones((C,), jnp.float32),
        "ln2_b": jnp.zeros((C,), jnp.float32),
        "w_fc1": 0.05 * jax.random.normal(keys[4], (C, hidden), jnp.float32),
        "b_fc1": 0.05 * jax.random.normal(keys[5], (hidden,), jnp.float32),
        "w_fc2": 0.05 * jax.random.normal(keys[6], (hidden, C), jnp.float32),
        "b_fc2": 0.05 * jax.random.normal(keys[7], (C,), jnp.float32),
    }

    x = jax.random.normal(keys[8], (B, N, C), jnp.float32)

    # ViR retention decay factors gamma_h = 1 - 2^(-5-h)
    gammas = 1.0 - 2.0 ** (-5.0 - jnp.arange(H, dtype=jnp.float32))

    out = block_forward(x, gammas, params)
    out = jax.block_until_ready(out)

    # reference uses the explicit (H, N, N) decay mask, exactly as the PyTorch module
    idx = jnp.arange(N)
    diff = (idx[:, None] - idx[None, :]).astype(jnp.float32)
    mask = jnp.where(diff[None] >= 0.0, gammas[:, None, None] ** diff[None], 0.0)
    ref = block_ref(x, mask, params)

    err = float(jnp.max(jnp.abs(out - ref)))
    assert err < 3e-2, f"mismatch vs reference: {err}"
    print("KERNEL_OK")
</pallas_src>

<mosaic_0001>
module attributes {stable_mosaic.version = 11 : i64} {
  func.func @kernel(%arg0: i32, %arg1: i32, %arg2: memref<1x8x32xf32, #tpu.memory_space<vmem>>, %arg3: memref<1x32xf32, #tpu.memory_space<vmem>>, %arg4: memref<1x32xf32, #tpu.memory_space<vmem>>, %arg5: memref<32x96xbf16, #tpu.memory_space<vmem>>, %arg6: memref<1x96xf32, #tpu.memory_space<vmem>>, %arg7: memref<1x4x8x8xbf16, #tpu.memory_space<vmem>>, %arg8: memref<1x4x8x8xbf16, #tpu.memory_space<vmem>>, %arg9: memref<1x4x8x8xbf16, #tpu.memory_space<vmem>>) attributes {dimension_semantics = [#tpu.dimension_semantics<parallel>, #tpu.dimension_semantics<parallel>], iteration_bounds = array<i64: 2, 1>, scalar_prefetch = 0 : i64, scratch_operands = 0 : i64, tpu.core_type = #tpu.core_type<tc>, window_params = [{transform_indices = @transform_0, window_bounds = array<i64: 1, 8, 32>}, {pipeline_mode = #tpu.pipeline_mode<synchronous>, transform_indices = @transform_1, window_bounds = array<i64: 1, 32>}, {pipeline_mode = #tpu.pipeline_mode<synchronous>, transform_indices = @transform_2, window_bounds = array<i64: 1, 32>}, {pipeline_mode = #tpu.pipeline_mode<synchronous>, transform_indices = @transform_3, window_bounds = array<i64: 32, 96>}, {pipeline_mode = #tpu.pipeline_mode<synchronous>, transform_indices = @transform_4, window_bounds = array<i64: 1, 96>}, {transform_indices = @transform_5, window_bounds = array<i64: 1, 4, 8, 8>}, {transform_indices = @transform_6, window_bounds = array<i64: 1, 4, 8, 8>}, {transform_indices = @transform_7, window_bounds = array<i64: 1, 4, 8, 8>}]} {
    %c0 = arith.constant 0 : index
    %c0_0 = arith.constant 0 : index
    %c0_1 = arith.constant 0 : index
    %0 = vector.load %arg2[%c0, %c0_0, %c0_1] : memref<1x8x32xf32, #tpu.memory_space<vmem>>, vector<1x8x32xf32>
    %1 = vector.shape_cast %0 : vector<1x8x32xf32> to vector<8x32xf32>
    %c0_2 = arith.constant 0 : index
    %c0_3 = arith.constant 0 : index
    %2 = vector.load %arg3[%c0_2, %c0_3] : memref<1x32xf32, #tpu.memory_space<vmem>>, vector<1x32xf32>
    %c0_4 = arith.constant 0 : index
    %c0_5 = arith.constant 0 : index
    %3 = vector.load %arg4[%c0_4, %c0_5] : memref<1x32xf32, #tpu.memory_space<vmem>>, vector<1x32xf32>
    %cst = arith.constant dense<0.000000e+00> : vector<8xf32>
    %4 = vector.multi_reduction <add>, %1, %cst [1] : vector<8x32xf32> to vector<8xf32>
    %5 = vector.shape_cast %4 : vector<8xf32> to vector<8x1xf32>
    %cst_6 = arith.constant 3.200000e+01 : f32
    %6 = vector.broadcast %cst_6 : f32 to vector<8x1xf32>
    %7 = arith.divf %5, %6 : vector<8x1xf32>
    %8 = vector.broadcast %7 : vector<8x1xf32> to vector<8x32xf32>
    %9 = arith.subf %1, %8 : vector<8x32xf32>
    %10 = arith.mulf %9, %9 : vector<8x32xf32>
    %cst_7 = arith.constant dense<0.000000e+00> : vector<8xf32>
    %11 = vector.multi_reduction <add>, %10, %cst_7 [1] : vector<8x32xf32> to vector<8xf32>
    %12 = vector.shape_cast %11 : vector<8xf32> to vector<8x1xf32>
    %cst_8 = arith.constant 3.200000e+01 : f32
    %13 = vector.broadcast %cst_8 : f32 to vector<8x1xf32>
    %14 = arith.divf %12, %13 : vector<8x1xf32>
    %cst_9 = arith.constant 9.99999974E-6 : f32
    %15 = vector.broadcast %cst_9 : f32 to vector<8x1xf32>
    %16 = arith.addf %14, %15 : vector<8x1xf32>
    %17 = math.rsqrt %16 : vector<8x1xf32>
    %18 = vector.broadcast %17 : vector<8x1xf32> to vector<8x32xf32>
    %19 = arith.mulf %9, %18 : vector<8x32xf32>
    %20 = vector.broadcast %2 : vector<1x32xf32> to vector<8x32xf32>
    %21 = arith.mulf %19, %20 : vector<8x32xf32>
    %22 = vector.broadcast %3 : vector<1x32xf32> to vector<8x32xf32>
    %23 = arith.addf %21, %22 : vector<8x32xf32>
    %24 = arith.truncf %23 : vector<8x32xf32> to vector<8x32xbf16>
    %c0_10 = arith.constant 0 : index
    %c0_11 = arith.constant 0 : index
    %25 = vector.load %arg5[%c0_10, %c0_11] : memref<32x96xbf16, #tpu.memory_space<vmem>>, vector<32x96xbf16>
    %cst_12 = arith.constant dense<0.000000e+00> : vector<8x96xf32>
    %26 = tpu.matmul %24, %25, %cst_12 {dimension_numbers = #tpu.dot_dimension_numbers<[1], [0], [0], [1], [0, 0, 1, 1], [], []>} : vector<8x32xbf16>, vector<32x96xbf16>, vector<8x96xf32> -> vector<8x96xf32>
    %c0_13 = arith.constant 0 : index
    %c0_14 = arith.constant 0 : index
    %27 = vector.load %arg6[%c0_13, %c0_14] : memref<1x96xf32, #tpu.memory_space<vmem>>, vector<1x96xf32>
    %28 = vector.broadcast %27 : vector<1x96xf32> to vector<8x96xf32>
    %29 = arith.addf %26, %28 : vector<8x96xf32>
    %30 = vector.extract_strided_slice %29 {offsets = [0, 0], sizes = [8, 8], strides = [1, 1]} : vector<8x96xf32> to vector<8x8xf32>
    %cst_15 = arith.constant 0.353553385 : f32
    %31 = vector.broadcast %cst_15 : f32 to vector<8x8xf32>
    %32 = arith.mulf %30, %31 : vector<8x8xf32>
    %33 = arith.truncf %32 : vector<8x8xf32> to vector<8x8xbf16>
    %c0_16 = arith.constant 0 : index
    %c0_17 = arith.constant 0 : index
    %c0_18 = arith.constant 0 : index
    %c0_19 = arith.constant 0 : index
    %34 = vector.load %arg7[%c0_16, %c0_17, %c0_18, %c0_19] : memref<1x4x8x8xbf16, #tpu.memory_space<vmem>>, vector<1x1x8x8xbf16>
    %35 = vector.shape_cast %34 : vector<1x1x8x8xbf16> to vector<8x8xbf16>
    %36 = vector.shape_cast %33 : vector<8x8xbf16> to vector<1x1x8x8xbf16>
    tpu.vector_store %arg7[%c0_16, %c0_17, %c0_18, %c0_19], %36 {strides = array<i32>} : memref<1x4x8x8xbf16, #tpu.memory_space<vmem>>, vector<1x1x8x8xbf16>,
    %37 = vector.extract_strided_slice %29 {offsets = [0, 32], sizes = [8, 8], strides = [1, 1]} : vector<8x96xf32> to vector<8x8xf32>
    %38 = arith.truncf %37 : vector<8x8xf32> to vector<8x8xbf16>
    %c0_20 = arith.constant 0 : index
    %c0_21 = arith.constant 0 : index
    %c0_22 = arith.constant 0 : index
    %c0_23 = arith.constant 0 : index
    %39 = vector.load %arg8[%c0_20, %c0_21, %c0_22, %c0_23] : memref<1x4x8x8xbf16, #tpu.memory_space<vmem>>, vector<1x1x8x8xbf16>
    %40 = vector.shape_cast %39 : vector<1x1x8x8xbf16> to vector<8x8xbf16>
    %41 = vector.shape_cast %38 : vector<8x8xbf16> to vector<1x1x8x8xbf16>
    tpu.vector_store %arg8[%c0_20, %c0_21, %c0_22, %c0_23], %41 {strides = array<i32>} : memref<1x4x8x8xbf16, #tpu.memory_space<vmem>>, vector<1x1x8x8xbf16>,
    %42 = vector.extract_strided_slice %29 {offsets = [0, 64], sizes = [8, 8], strides = [1, 1]} : vector<8x96xf32> to vector<8x8xf32>
    %43 = arith.truncf %42 : vector<8x8xf32> to vector<8x8xbf16>
    %c0_24 = arith.constant 0 : index
    %c0_25 = arith.constant 0 : index
    %c0_26 = arith.constant 0 : index
    %c0_27 = arith.constant 0 : index
    %44 = vector.load %arg9[%c0_24, %c0_25, %c0_26, %c0_27] : memref<1x4x8x8xbf16, #tpu.memory_space<vmem>>, vector<1x1x8x8xbf16>
    %45 = vector.shape_cast %44 : vector<1x1x8x8xbf16> to vector<8x8xbf16>
    %46 = vector.shape_cast %43 : vector<8x8xbf16> to vector<1x1x8x8xbf16>
    tpu.vector_store %arg9[%c0_24, %c0_25, %c0_26, %c0_27], %46 {strides = array<i32>} : memref<1x4x8x8xbf16, #tpu.memory_space<vmem>>, vector<1x1x8x8xbf16>,
    %47 = vector.extract_strided_slice %29 {offsets = [0, 8], sizes = [8, 8], strides = [1, 1]} : vector<8x96xf32> to vector<8x8xf32>
    %cst_28 = arith.constant 0.353553385 : f32
    %48 = vector.broadcast %cst_28 : f32 to vector<8x8xf32>
    %49 = arith.mulf %47, %48 : vector<8x8xf32>
    %50 = arith.truncf %49 : vector<8x8xf32> to vector<8x8xbf16>
    %c0_29 = arith.constant 0 : index
    %c1 = arith.constant 1 : index
    %c0_30 = arith.constant 0 : index
    %c0_31 = arith.constant 0 : index
    %51 = vector.load %arg7[%c0_29, %c1, %c0_30, %c0_31] : memref<1x4x8x8xbf16, #tpu.memory_space<vmem>>, vector<1x1x8x8xbf16>
    %52 = vector.shape_cast %51 : vector<1x1x8x8xbf16> to vector<8x8xbf16>
    %53 = vector.shape_cast %50 : vector<8x8xbf16> to vector<1x1x8x8xbf16>
    tpu.vector_store %arg7[%c0_29, %c1, %c0_30, %c0_31], %53 {strides = array<i32>} : memref<1x4x8x8xbf16, #tpu.memory_space<vmem>>, vector<1x1x8x8xbf16>,
    %54 = vector.extract_strided_slice %29 {offsets = [0, 40], sizes = [8, 8], strides = [1, 1]} : vector<8x96xf32> to vector<8x8xf32>
    %55 = arith.truncf %54 : vector<8x8xf32> to vector<8x8xbf16>
    %c0_32 = arith.constant 0 : index
    %c1_33 = arith.constant 1 : index
    %c0_34 = arith.constant 0 : index
    %c0_35 = arith.constant 0 : index
    %56 = vector.load %arg8[%c0_32, %c1_33, %c0_34, %c0_35] : memref<1x4x8x8xbf16, #tpu.memory_space<vmem>>, vector<1x1x8x8xbf16>
    %57 = vector.shape_cast %56 : vector<1x1x8x8xbf16> to vector<8x8xbf16>
    %58 = vector.shape_cast %55 : vector<8x8xbf16> to vector<1x1x8x8xbf16>
    tpu.vector_store %arg8[%c0_32, %c1_33, %c0_34, %c0_35], %58 {strides = array<i32>} : memref<1x4x8x8xbf16, #tpu.memory_space<vmem>>, vector<1x1x8x8xbf16>,
    %59 = vector.extract_strided_slice %29 {offsets = [0, 72], sizes = [8, 8], strides = [1, 1]} : vector<8x96xf32> to vector<8x8xf32>
    %60 = arith.truncf %59 : vector<8x8xf32> to vector<8x8xbf16>
    %c0_36 = arith.constant 0 : index
    %c1_37 = arith.constant 1 : index
    %c0_38 = arith.constant 0 : index
    %c0_39 = arith.constant 0 : index
    %61 = vector.load %arg9[%c0_36, %c1_37, %c0_38, %c0_39] : memref<1x4x8x8xbf16, #tpu.memory_space<vmem>>, vector<1x1x8x8xbf16>
    %62 = vector.shape_cast %61 : vector<1x1x8x8xbf16> to vector<8x8xbf16>
    %63 = vector.shape_cast %60 : vector<8x8xbf16> to vector<1x1x8x8xbf16>
    tpu.vector_store %arg9[%c0_36, %c1_37, %c0_38, %c0_39], %63 {strides = array<i32>} : memref<1x4x8x8xbf16, #tpu.memory_space<vmem>>, vector<1x1x8x8xbf16>,
    %64 = vector.extract_strided_slice %29 {offsets = [0, 16], sizes = [8, 8], strides = [1, 1]} : vector<8x96xf32> to vector<8x8xf32>
    %cst_40 = arith.constant 0.353553385 : f32
    %65 = vector.broadcast %cst_40 : f32 to vector<8x8xf32>
    %66 = arith.mulf %64, %65 : vector<8x8xf32>
    %67 = arith.truncf %66 : vector<8x8xf32> to vector<8x8xbf16>
    %c0_41 = arith.constant 0 : index
    %c2 = arith.constant 2 : index
    %c0_42 = arith.constant 0 : index
    %c0_43 = arith.constant 0 : index
    %68 = vector.load %arg7[%c0_41, %c2, %c0_42, %c0_43] : memref<1x4x8x8xbf16, #tpu.memory_space<vmem>>, vector<1x1x8x8xbf16>
    %69 = vector.shape_cast %68 : vector<1x1x8x8xbf16> to vector<8x8xbf16>
    %70 = vector.shape_cast %67 : vector<8x8xbf16> to vector<1x1x8x8xbf16>
    tpu.vector_store %arg7[%c0_41, %c2, %c0_42, %c0_43], %70 {strides = array<i32>} : memref<1x4x8x8xbf16, #tpu.memory_space<vmem>>, vector<1x1x8x8xbf16>,
    %71 = vector.extract_strided_slice %29 {offsets = [0, 48], sizes = [8, 8], strides = [1, 1]} : vector<8x96xf32> to vector<8x8xf32>
    %72 = arith.truncf %71 : vector<8x8xf32> to vector<8x8xbf16>
    %c0_44 = arith.constant 0 : index
    %c2_45 = arith.constant 2 : index
    %c0_46 = arith.constant 0 : index
    %c0_47 = arith.constant 0 : index
    %73 = vector.load %arg8[%c0_44, %c2_45, %c0_46, %c0_47] : memref<1x4x8x8xbf16, #tpu.memory_space<vmem>>, vector<1x1x8x8xbf16>
    %74 = vector.shape_cast %73 : vector<1x1x8x8xbf16> to vector<8x8xbf16>
    %75 = vector.shape_cast %72 : vector<8x8xbf16> to vector<1x1x8x8xbf16>
    tpu.vector_store %arg8[%c0_44, %c2_45, %c0_46, %c0_47], %75 {strides = array<i32>} : memref<1x4x8x8xbf16, #tpu.memory_space<vmem>>, vector<1x1x8x8xbf16>,
    %76 = vector.extract_strided_slice %29 {offsets = [0, 80], sizes = [8, 8], strides = [1, 1]} : vector<8x96xf32> to vector<8x8xf32>
    %77 = arith.truncf %76 : vector<8x8xf32> to vector<8x8xbf16>
    %c0_48 = arith.constant 0 : index
    %c2_49 = arith.constant 2 : index
    %c0_50 = arith.constant 0 : index
    %c0_51 = arith.constant 0 : index
    %78 = vector.load %arg9[%c0_48, %c2_49, %c0_50, %c0_51] : memref<1x4x8x8xbf16, #tpu.memory_space<vmem>>, vector<1x1x8x8xbf16>
    %79 = vector.shape_cast %78 : vector<1x1x8x8xbf16> to vector<8x8xbf16>
    %80 = vector.shape_cast %77 : vector<8x8xbf16> to vector<1x1x8x8xbf16>
    tpu.vector_store %arg9[%c0_48, %c2_49, %c0_50, %c0_51], %80 {strides = array<i32>} : memref<1x4x8x8xbf16, #tpu.memory_space<vmem>>, vector<1x1x8x8xbf16>,
    %81 = vector.extract_strided_slice %29 {offsets = [0, 24], sizes = [8, 8], strides = [1, 1]} : vector<8x96xf32> to vector<8x8xf32>
    %cst_52 = arith.constant 0.353553385 : f32
    %82 = vector.broadcast %cst_52 : f32 to vector<8x8xf32>
    %83 = arith.mulf %81, %82 : vector<8x8xf32>
    %84 = arith.truncf %83 : vector<8x8xf32> to vector<8x8xbf16>
    %c0_53 = arith.constant 0 : index
    %c3 = arith.constant 3 : index
    %c0_54 = arith.constant 0 : index
    %c0_55 = arith.constant 0 : index
    %85 = vector.load %arg7[%c0_53, %c3, %c0_54, %c0_55] : memref<1x4x8x8xbf16, #tpu.memory_space<vmem>>, vector<1x1x8x8xbf16>
    %86 = vector.shape_cast %85 : vector<1x1x8x8xbf16> to vector<8x8xbf16>
    %87 = vector.shape_cast %84 : vector<8x8xbf16> to vector<1x1x8x8xbf16>
    tpu.vector_store %arg7[%c0_53, %c3, %c0_54, %c0_55], %87 {strides = array<i32>} : memref<1x4x8x8xbf16, #tpu.memory_space<vmem>>, vector<1x1x8x8xbf16>,
    %88 = vector.extract_strided_slice %29 {offsets = [0, 56], sizes = [8, 8], strides = [1, 1]} : vector<8x96xf32> to vector<8x8xf32>
    %89 = arith.truncf %88 : vector<8x8xf32> to vector<8x8xbf16>
    %c0_56 = arith.constant 0 : index
    %c3_57 = arith.constant 3 : index
    %c0_58 = arith.constant 0 : index
    %c0_59 = arith.constant 0 : index
    %90 = vector.load %arg8[%c0_56, %c3_57, %c0_58, %c0_59] : memref<1x4x8x8xbf16, #tpu.memory_space<vmem>>, vector<1x1x8x8xbf16>
    %91 = vector.shape_cast %90 : vector<1x1x8x8xbf16> to vector<8x8xbf16>
    %92 = vector.shape_cast %89 : vector<8x8xbf16> to vector<1x1x8x8xbf16>
    tpu.vector_store %arg8[%c0_56, %c3_57, %c0_58, %c0_59], %92 {strides = array<i32>} : memref<1x4x8x8xbf16, #tpu.memory_space<vmem>>, vector<1x1x8x8xbf16>,
    %93 = vector.extract_strided_slice %29 {offsets = [0, 88], sizes = [8, 8], strides = [1, 1]} : vector<8x96xf32> to vector<8x8xf32>
    %94 = arith.truncf %93 : vector<8x8xf32> to vector<8x8xbf16>
    %c0_60 = arith.constant 0 : index
    %c3_61 = arith.constant 3 : index
    %c0_62 = arith.constant 0 : index
    %c0_63 = arith.constant 0 : index
    %95 = vector.load %arg9[%c0_60, %c3_61, %c0_62, %c0_63] : memref<1x4x8x8xbf16, #tpu.memory_space<vmem>>, vector<1x1x8x8xbf16>
    %96 = vector.shape_cast %95 : vector<1x1x8x8xbf16> to vector<8x8xbf16>
    %97 = vector.shape_cast %94 : vector<8x8xbf16> to vector<1x1x8x8xbf16>
    tpu.vector_store %arg9[%c0_60, %c3_61, %c0_62, %c0_63], %97 {strides = array<i32>} : memref<1x4x8x8xbf16, #tpu.memory_space<vmem>>, vector<1x1x8x8xbf16>,
    return
  }
  func.func @transform_0(%arg0: i32, %arg1: i32) -> (i32, i32, i32) {
    %c0_i32 = arith.constant 0 : i32
    %c0_i32_0 = arith.constant 0 : i32
    return %arg0, %arg1, %c0_i32 : i32, i32, i32
  }
  func.func @transform_1(%arg0: i32, %arg1: i32) -> (i32, i32) {
    %c0_i32 = arith.constant 0 : i32
    %c0_i32_0 = arith.constant 0 : i32
    %c0_i32_1 = arith.constant 0 : i32
    return %c0_i32, %c0_i32_0 : i32, i32
  }
  func.func @transform_2(%arg0: i32, %arg1: i32) -> (i32, i32) {
    %c0_i32 = arith.constant 0 : i32
    %c0_i32_0 = arith.constant 0 : i32
    %c0_i32_1 = arith.constant 0 : i32
    return %c0_i32, %c0_i32_0 : i32, i32
  }
  func.func @transform_3(%arg0: i32, %arg1: i32) -> (i32, i32) {
    %c0_i32 = arith.constant 0 : i32
    %c0_i32_0 = arith.constant 0 : i32
    %c0_i32_1 = arith.constant 0 : i32
    return %c0_i32, %c0_i32_0 : i32, i32
  }
  func.func @transform_4(%arg0: i32, %arg1: i32) -> (i32, i32) {
    %c0_i32 = arith.constant 0 : i32
    %c0_i32_0 = arith.constant 0 : i32
    %c0_i32_1 = arith.constant 0 : i32
    return %c0_i32, %c0_i32_0 : i32, i32
  }
  func.func @transform_5(%arg0: i32, %arg1: i32) -> (i32, i32, i32, i32) {
    %c0_i32 = arith.constant 0 : i32
    %c0_i32_0 = arith.constant 0 : i32
    %c0_i32_1 = arith.constant 0 : i32
    return %arg0, %c0_i32, %arg1, %c0_i32_0 : i32, i32, i32, i32
  }
  func.func @transform_6(%arg0: i32, %arg1: i32) -> (i32, i32, i32, i32) {
    %c0_i32 = arith.constant 0 : i32
    %c0_i32_0 = arith.constant 0 : i32
    %c0_i32_1 = arith.constant 0 : i32
    return %arg0, %c0_i32, %arg1, %c0_i32_0 : i32, i32, i32, i32
  }
  func.func @transform_7(%arg0: i32, %arg1: i32) -> (i32, i32, i32, i32) {
    %c0_i32 = arith.constant 0 : i32
    %c0_i32_0 = arith.constant 0 : i32
    %c0_i32_1 = arith.constant 0 : i32
    return %arg0, %c0_i32, %arg1, %c0_i32_0 : i32, i32, i32, i32
  }
}

</mosaic_0001>

<bundles_post_ra>
// kernel: tpu_custom_call.1
= control target key start
LH: loop header
LB: loop body
LE: loop exit
PB: predicated region body
PF: predicated region fallthrough
CT: control target
= control target key end

     0   :  { %s1495_s0 = inlined_call_operand.hbm [shape: f32[2,8,32], index: 0, kind: input, shape index: {}]   ;;  %s1496_s1 = inlined_call_operand.vmem [shape: f32[1,32], index: 1, kind: input, shape index: {}]   ;;  %s1497_s2 = inlined_call_operand.vmem [shape: f32[1,32], index: 2, kind: input, shape index: {}]   ;;  %s1498_s3 = inlined_call_operand.hbm [shape: bf16[32,96], index: 3, kind: input, shape index: {}]   ;;  %s1499_s4 = inlined_call_operand.vmem [shape: f32[1,96], index: 4, kind: input, shape index: {}]   ;;  %s1500_s5 = inlined_call_operand.hbm [shape: bf16[2,4,8,8], index: 5, kind: output, shape index: {0}]   ;;  %s1501_s6 = inlined_call_operand.hbm [shape: bf16[2,4,8,8], index: 6, kind: output, shape index: {1}]   ;;  %s1502_s7 = inlined_call_operand.hbm [shape: bf16[2,4,8,8], index: 7, kind: output, shape index: {2}]  }
   0x1   :  { %1510 = sst [smem:[#allocation16_spill]] %s1498_s3 }
   0x2   :  { %13 = vsyncpa [#allocation3], 0 }
   0x3   :  { %15 = vsyncpa [#allocation3 + $0x1], 0 }
   0x4   :  { %16 = vsyncpa [#allocation6], 0 }
   0x5   :  { %17 = vsyncpa [#allocation4], 0 }
   0x6   :  { %19 = vsyncpa [#allocation4 + $0x1], 0 }
   0x7   :  { %20 = vsyncpa [#allocation9], 0 }
   0x8   :  { %22 = vsyncpa [#allocation9 + $0x1], 0  ;;  %s1157_s24 = smov 0   ;;  %s1159_s25 = smov 0  }
   0x9   :  { %s1161_s26 = smov 0   ;;  %s1163_s27 = smov 0  }
   0xa   :  { %s1165_s28 = smov 0   ;;  %s1167_s29 = smov 0  }
   0xb LB: > { %s1188_s30 = sadd.s32 4294967295, %s1094_s29   ;;  %s1506_s8 = sadd.s32 4294967294, %s1094_s29   ;;  %s1094_s29 = sphi %s1167_s29, %s28_s29   ;;  %s1090_s28 = sphi %s1165_s28, %s1535_s28   ;;  %s1086_s27 = sphi %s1163_s27, %s1534_s27   ;;  %s1082_s26 = sphi %s1161_s26, %s1533_s26   ;;  %s1078_s25 = sphi %s1159_s25, %s1532_s25   ;;  %s1074_s24 = sphi %s1157_s24, %s1531_s24  }
   0xc   : > { %p62_p0 = scmp.ne.s32.totalorder %s1078_s25, %s1074_s24  ;;  %p1503_p1 = scmp.eq.s32.totalorder %s1188_s30, 0 }
   0xd   : > { %p178_p3 = scmp.eq.s32.totalorder %s1506_s8, 1  ;;  %p732_p5 = scmp.ge.s32.totalorder %s1094_s29, 1 }
   0xe   : > { %p1199_p4 = por %p1503_p1, %p62_p0  ;;  %p241_p7 = scmp.lt.s32.totalorder %s1094_s29, 3 }
   0xf   : > { %p1204_p6 = por %p178_p3, %p62_p0  ;;  %s1096_s12 = smov [#allocation5]  }
  0x10   : > { %s1511_s9 = scalar_select %p1199_p4, 1, 0 }
  0x11   : > { %s1512_s10 = scalar_select %p1204_p6, 1, 0 }
  0x12   : > { %p1209_p8 = pnand %p732_p5, %p241_p7  ;;  %s259_s13 = sshll.u32 %s1096_s12, 4  ;;  %s260_s13 = int_to_ptr.vmem [resolvable:$true] %s259_s13 }
  0x13   : > { %s40_s15 = sadd.s32 1, %s1090_s28  ;;  %s1515_s3 = sld [smem:[#allocation16_spill]] }
  0x14   : > { %s1513_s11 = scalar_select %p1209_p8, 1, 0 }
  0x15   : > { %p799_p9 = pneg %p1209_p8 }
  0x17   : > { %p1218_p11 = pnand %p799_p9, %p1503_p1 }
  0x19   : > { %s890_s18 = scalar_lea.hbm %s1515_s3, 256  ;;  %p892_p13 = pneg %p1218_p11 }
  0x1a   : > { %p891_p12 = scmp.ne.s32.totalorder %s1515_s3, %s890_s18  ;;  %p897_p5 = scmp.lt.u32.totalorder %s890_s18, %s1515_s3 }
  0x1c   : > { %p893_p0 = pnand %p892_p13, %p891_p12 }
  0x1e   : > { %p894_p3 = pneg %p893_p0 }
  0x20   : > { %p899_p7 = pnand %p897_p5, %p894_p3 }
  0x22   : > { %902 = shalt.err (!%p899_p7)
}
  0x23   : > { %s903_s23 = scalar_lea.vmem %s260_s13, 256  ;;  %p911_p2 = scmp.lt.s32.totalorder %s260_s13, %s260_s13 }
  0x24   : > { %p904_p9 = scmp.ne.s32.totalorder %s260_s13, %s903_s23  ;;  %p912_p6 = scmp.lt.s32.totalorder %s903_s23, %s903_s23 }
  0x26   : > { %p906_p10 = pnand %p904_p9, %p892_p13  ;;  %p913_p4 = por %p912_p6, %p911_p2 }
  0x28   : > { %p907_p1 = pneg %p906_p10 }
  0x2a   : > { %p914_p8 = pnand %p913_p4, %p907_p1 }
  0x2c   : > { %917 = shalt.err (!%p914_p8)
}
  0x2d   : > { %s1097_s12 = smov 64   ;;  %s1098_s16 = smov 4  }
  0x2e   : > { %802 = dma.hbm_to_vmem [thread:$0]  (!%p1218_p11), %s1515_s3, 256, %s260_s13, [#allocation6], %s1097_s12, %s1097_s12, %s1098_s16  }
  0x2f   : > { %p42_p1 = scmp.ge.s32.totalorder %s40_s15, 2  ;;  %s49_s19 = sadd.s32 1, %s1082_s26 }
  0x30   : > { %p56_p2 = scmp.ne.s32.totalorder %s1082_s26, %s1078_s25  ;;  %p57_p4 = scmp.eq.s32.totalorder %s1094_s29, 0 }
  0x31   : > { %s1537_s15 = smov (%p42_p1, %s40_s15), 0  ;;  %p1518_p8 = scmp.eq.s32.totalorder %s1188_s30, 1 }
  0x32   : > { %1516 = sst [smem:[#allocation15_spill]] %s1537_s15  ;;  %p1245_p6 = por %p57_p4, %p56_p2 }
  0x33   : > { %p1251_p10 = por %p1518_p8, %p56_p2  ;;  %s44_s14 = ssub.s32 %s1090_s28, %s1537_s15 }
  0x34   : > { %p818_p12 = scmp.lt.s32.totalorder %s1094_s29, 2  ;;  %p47_p11 = scmp.eq.s32.totalorder %s44_s14, 0 }
  0x35   : > { %s276_s13 = sand.u32 1, %s1082_s26   ;;  %s736_s12 = sshll.u32 %s1090_s28, 7 }
  0x36   : > { %s735_s22 = sshll.u32 %s276_s13, 3  ;;  %s1266_s18 = scalar_lea.hbm %s1495_s0, %s736_s12 }
  0x37   : > { %s1260_s23 = scalar_select %p47_p11, %s1082_s26, %s49_s19  }
  0x38   : > { %s280_s8 = scalar_lea.vmem [#allocation2], %s735_s22  ;;  %p1272_p13 = pnand %p818_p12, %p1245_p6 }
  0x39   : > { %s288_s3 = sshll.u32 %s280_s8, 4  ;;  %s277_s19 = scalar_lea.sflag [#allocation3], %s276_s13  ;;  %s1268_s3 = int_to_ptr.vmem [resolvable:$true] %s288_s3 }
  0x3a   : > { %s918_s15 = scalar_lea.hbm %s1266_s18, 128  ;;  %p920_p3 = pneg %p1272_p13 }
  0x3b   : > { %p919_p0 = scmp.ne.s32.totalorder %s1266_s18, %s918_s15  ;;  %s923_s12 = scalar_lea.hbm %s1495_s0, 256 }
  0x3c   : > { %p924_p9 = scmp.lt.u32.totalorder %s1266_s18, %s1495_s0  ;;  %p925_p1 = scmp.lt.u32.totalorder %s923_s12, %s918_s15 }
  0x3d   : > { %p921_p5 = pnand %p920_p3, %p919_p0  ;;  %p927_p4 = scmp.lt.u32.totalorder %s918_s15, %s1266_s18 }
  0x3e   : > { %p926_p2 = por %p925_p1, %p924_p9 }
  0x3f   : > { %p922_p7 = pneg %p921_p5 }
  0x40   : > { %p928_p6 = por %p927_p4, %p926_p2 }
  0x42   : > { %p929_p8 = pnand %p928_p6, %p922_p7 }
  0x44   : > { %932 = shalt.err (!%p929_p8)
}
  0x45   : > { %s933_s13 = scalar_lea.vmem %s1268_s3, 128  ;;  %s1099_s17 = smov [#allocation2]  }
  0x46   : > { %p934_p12 = scmp.ne.s32.totalorder %s1268_s3, %s933_s13  ;;  %s938_s22 = sshll.u32 %s1099_s17, 4  ;;  %s939_s22 = int_to_ptr.vmem [resolvable:$false] %s938_s22 }
  0x47   : > { %s940_s8 = scalar_lea.vmem %s939_s22, 256  ;;  %p941_p5 = scmp.lt.s32.totalorder %s1268_s3, %s939_s22 }
  0x48   : > { %p936_p11 = pnand %p934_p12, %p920_p3  ;;  %p942_p9 = scmp.lt.s32.totalorder %s940_s8, %s933_s13 }
  0x4a   : > { %p937_p0 = pneg %p936_p11  ;;  %p943_p1 = por %p942_p9, %p941_p5 }
  0x4c   : > { %p944_p2 = pnand %p943_p1, %p937_p0 }
  0x4e   : > { %947 = shalt.err (!%p944_p2)
}
  0x4f   : > { %806 = dma.hbm_to_vmem [thread:$0]  (!%p1272_p13), %s1266_s18, 128, %s1268_s3, %s277_s19  }
  0x50   : > { %p1521_p7 = scmp.ne.s32.totalorder %s1513_s11, 0 }
  0x51   : > { %s1304_s15 = sand.u32 (!%p1521_p7), 1, %s1078_s25   ;;  %p1522_p3 = scmp.ne.s32.totalorder (!%p1521_p7), %s1511_s9, 0 }
  0x52   : > { %297 = sbr.rel (%p1521_p7) target bundleno = 816 (0x330), region = 40  ;;  %s738_s12 = sshll.u32 (!%p1521_p7), %s1304_s15, 3 }
  0x53   : > { %s300_s20 = scalar_lea.sflag (!%p1521_p7), [#allocation3], %s1304_s15  ;;  %s303_s16 = scalar_lea.vmem (!%p1521_p7), [#allocation2], %s738_s12 }
  0x59   : > { %1057 = dma.done.wait (%p1522_p3), %s300_s20, 128  }
  0x5a   : > { %1059 = vsyncadd (%p1522_p3), %s300_s20, 4294967168  ;;  %p1523_p4 = scmp.eq.s32.totalorder %s1188_s30, 0 }
  0x5c   : > { %1061 = dma.done.wait (%p1523_p4), [#allocation6], 256   ;;  %p1524_p13 = pmov %p1523_p4 }
  0x5d   : > { %vm352_vm0 = vcmask 261120   ;;  %v349_v0 = vld [vmem:[%s303_s16] sm:$0xff]  ;;  %v886_v7 = vld [vmem:[#allocation5] sm:$0xff]   ;;  %v1100_v8 = vmov 0.0   ;;  %vm1101_vm1 = vmmov 0   ;;  %v887_v9 = vld [vmem:[#allocation5 + $0x8] sm:$0xff]  }
  0x5e   : > { %1063 = vsyncadd (%p1524_p13), [#allocation6], 4294967040  ;;  %v353_v1 = vsel %vm352_vm0, %v349_v0, 0.0  ;;  %779 = vmatprep.subr.bf16.mxu0 %v1100_v8  ;;  %783 = vmatprep.mubr.msk.bf16.mxu0 %vm1101_vm1, %v1100_v8  ;;  %v743_v14 = vld [vmem:[%s1496_s1] ss:$0 sm:$0xff]  ;;  %s1329_s13 = sshll.u32 %s1304_s15, 4 }
  0x5f   : > { %354 = vadd.xlane.f32.xlu0 %v353_v1  ;;  %780 = vmatpush3.bf16.msra.mxu0 %v886_v7  ;;  %v744_v16 = vld [vmem:[%s1497_s2] ss:$0 sm:$0xff]  ;;  %vm450_vm2 = vcmask 60416   ;;  %s1102_s17 = smov 80   ;;  %s1103_s22 = smov 96  }
  0x60   : > { %781 = vmatprep.subr.bf16.mxu0 %v1100_v8  ;;  %v745_v20 = vld [vmem:[%s1499_s4] ss:$0 sm:$0xff]  ;;  %s1332_s8 = scalar_lea.vmem [#allocation7], %s1329_s13  ;;  %s1104_s12 = smov 88  }
  0x61   : > { %s1105_s20 = smov 104   ;;  %s1106_s16 = smov 72  }
  0x62   : > { %s1508_s3 = smov 64   ;;  %s1108_s9 = smov 56  }
  0x63   : > { %782 = vmatpush3.bf16.msra.mxu0 %v887_v9  ;;  %s1109_s11 = smov 48   ;;  %s1110_s18 = smov 120  }
  0x64   : > { %s1111_s14 = smov 112   ;;  %s1112_s19 = smov 40  }
  0xec   : > { %v355_v2 = vpop.xlane.xlu0 %354 }
  0xed   : > { %v357_v3 = vmul.f32 0.03125, %v355_v2 }
  0xef   : > { %v358_v4 = vsub.f32 %v349_v0, %v357_v3 }
  0xf1   : > { %v359_v5 = vmul.f32 %v358_v4, %v358_v4 }
  0xf3   : > { %v360_v6 = vsel %vm352_vm0, %v359_v5, 0.0 }
  0xf4   : > { %361 = vadd.xlane.f32.xlu0 %v360_v6 }
 0x181   : > { %v362_v10 = vpop.xlane.xlu0 %361 }
 0x182   : > { %v363_v11 = vmul.f32 0.03125, %v362_v10 }
 0x184   : > { %v364_v12 = vadd.f32 1e-05, %v363_v11 }
 0x186   : > { %888 = vrsqrt.f32 %v364_v12 }
 0x190   : > { %v889_v13 = vpop.eup %888 }
 0x191   : > { %v366_v15 = vmul.f32 %v889_v13, %v358_v4 }
 0x193   : > { %v373_v17 = vmul.f32 %v743_v14, %v366_v15 }
 0x195   : > { %v380_v18 = vadd.f32 %v744_v16, %v373_v17 }
 0x197   : > { %v381_v19 = vpack.c.bf16 %v380_v18, %v380_v18 }
 0x199   : > { %784 = vmatmul.mubr.msk.bf16.vlgmr.msra.gmra.mrb[0].mxu0 %vm352_vm0, %v381_v19 }
 0x26c   : > { %v442_v21 = vpop.f32.mrb[0].mxu0 }
 0x26d   : > { %v443_v22 = vadd.f32 %v745_v20, %v442_v21  ;;  %v785_v23 = vpop.f32.mrb[1].mxu0 }
 0x26e   : > { %v445_v24 = vpop.f32.mrb[2].mxu0 }
 0x26f   : > { %v448_v25 = vmul.f32 0.35355338, %v443_v22  ;;  %v771_v26 = vpack.c.bf16 %v443_v22, %v443_v22  ;;  %v786_v27 = vpop.f32.mrb[3].mxu0 }
 0x271   : > { %v449_v28 = vpack.c.bf16 %v448_v25, %v448_v25  ;;  %487 = vrot.lane.b32.xlu0 %v771_v26, %s1102_s17  ;;  %456 = vrot.lane.b32.xlu1 %v771_v26, %s1103_s22  ;;  %s340_s17 = scalar_lea.vmem [#allocation8], %s1329_s13 }
 0x272   : > { %s554_s22 = sshll.u32 %s340_s17, 4  ;;  %s1347_s22 = int_to_ptr.vmem [resolvable:$true] %s554_s22 }
 0x273   : > { %451 = vst.msk [vmem:[%s1332_s8] sm:$0xf] %vm450_vm2, %v449_v28 }
 0x275   : > { %472 = vrot.lane.b32.xlu1 %v771_v26, %s1104_s12  ;;  %497 = vrot.lane.b32.xlu0 %v449_v28, %s1105_s20  ;;  %s517_s12 = sand.u32 1, %s1188_s30   ;;  %s1342_s20 = sshll.u32 %s1086_s27, 8 }
 0x276   : > { %s1356_s27 = scalar_lea.sflag [#allocation9], %s517_s12  ;;  %s948_s30 = scalar_lea.vmem %s1347_s22, 256 }
 0x277   : > { %p949_p6 = scmp.ne.s32.totalorder %s1347_s22, %s948_s30 }
 0x279   : > { %502 = vrot.lane.b32.xlu1 %v771_v26, %s1106_s16  ;;  %p950_p8 = pnand %p949_p6, %p1251_p10 }
 0x27b   : > { %p951_p12 = pneg %p950_p8 }
 0x27d   : > { %460 = vrot.lane.b32.xlu1 %v771_v26, %s1508_s3 }
 0x281   : > { %477 = vrot.lane.b32.xlu1 %v771_v26, %s1108_s9 }
 0x285   : > { %492 = vrot.lane.b32.xlu1 %v771_v26, %s1109_s11  ;;  %s1353_s11 = scalar_lea.hbm %s1501_s6, %s1342_s20 }
 0x289   : > { %467 = vrot.lane.b32.xlu1 %v449_v28, %s1110_s18  ;;  %s1113_s18 = smov [#allocation8]  }
 0x28d   : > { %482 = vrot.lane.b32.xlu1 %v449_v28, %s1111_s14  ;;  %s952_s14 = sshll.u32 %s1113_s18, 4  ;;  %s953_s14 = int_to_ptr.vmem [resolvable:$false] %s952_s14 }
 0x28e   : > { %p955_p11 = scmp.lt.s32.totalorder %s1347_s22, %s953_s14 }
 0x291   : > { %507 = vrot.lane.b32.xlu1 %v771_v26, %s1112_s19  ;;  %s954_s19 = scalar_lea.vmem %s953_s14, 512 }
 0x292   : > { %p956_p0 = scmp.lt.s32.totalorder %s954_s19, %s948_s30 }
 0x294   : > { %p957_p5 = por %p956_p0, %p955_p11 }
 0x296   : > { %p958_p9 = pnand %p957_p5, %p951_p12 }
 0x2e3   : > { %v488_v29 = vpop.permute.xlu0 %487  ;;  %v457_v30 = vpop.permute.xlu1 %456 }
 0x2e4   : > { %755 = vst.msk [vmem:[%s340_s17 + $0x8] sm:$0xf] %vm450_vm2, %v488_v29  ;;  %459 = vst.msk [vmem:[%s340_s17] sm:$0xf] %vm450_vm2, %v457_v30 }
 0x2e7   : > { %v473_v31 = vpop.permute.xlu1 %472  ;;  %v498_v32 = vpop.permute.xlu0 %497 }
 0x2e8   : > { %752 = vst.msk [vmem:[%s340_s17 + $0x4] sm:$0xf] %vm450_vm2, %v473_v31  ;;  %757 = vst.msk [vmem:[%s1332_s8 + $0xc] sm:$0xf] %vm450_vm2, %v498_v32 }
 0x2eb   : > { %v503_v33 = vpop.permute.xlu1 %502 }
 0x2ec   : > { %758 = vst.msk [vmem:[%s340_s17 + $0xc] sm:$0xf] %vm450_vm2, %v503_v33 }
 0x2ed   : > { %961 = shalt.err (!%p958_p9)
}
 0x2ee   : > { %s962_s17 = scalar_lea.hbm %s1353_s11, 256  ;;  %s966_s9 = scalar_lea.hbm %s1501_s6, 512 }
 0x2ef   : > { %p963_p1 = scmp.ne.s32.totalorder %s1353_s11, %s962_s17  ;;  %p967_p3 = scmp.lt.u32.totalorder %s1353_s11, %s1501_s6 }
 0x2f0   : > { %p968_p4 = scmp.lt.u32.totalorder %s966_s9, %s962_s17  ;;  %p970_p6 = scmp.lt.u32.totalorder %s962_s17, %s1353_s11 }
 0x2f1   : > { %p964_p2 = pnand %p963_p1, %p1251_p10 }
 0x2f2   : > { %p969_p13 = por %p968_p4, %p967_p3 }
 0x2f3   : > { %p965_p7 = pneg %p964_p2 }
 0x2f4   : > { %p971_p8 = por %p970_p6, %p969_p13 }
 0x2f6   : > { %p972_p12 = pnand %p971_p8, %p965_p7 }
 0x2f8   : > { %975 = shalt.err (!%p972_p12)
}
 0x2f9   : > { %s1114_s30 = smov 4   ;;  %v461_v34 = vpop.permute.xlu1 %460  ;;  %s1384_s19 = scalar_lea.vmem [#allocation10], %s1329_s13 }
 0x2fa   : > { %794 = dma.vmem_to_hbm [thread:$0]  (%p1251_p10), %s1347_s22, 256, %s1353_s11, %s1356_s27, %s1508_s3, %s1508_s3, %s1114_s30  }
 0x2fb   : > { %463 = vst.msk [vmem:[%s1384_s19] sm:$0xf] %vm450_vm2, %v461_v34  ;;  %s537_s17 = sshll.u32 %s1332_s8, 4  ;;  %s1401_s11 = scalar_lea.hbm %s1500_s5, %s1342_s20  ;;  %s1395_s17 = int_to_ptr.vmem [resolvable:$true] %s537_s17 }
 0x2fc   : > { %s513_s16 = scalar_lea.sflag [#allocation4], %s1304_s15  ;;  %s976_s9 = scalar_lea.vmem %s1395_s17, 256 }
 0x2fd   : > { %v478_v35 = vpop.permute.xlu1 %477  ;;  %p977_p11 = scmp.ne.s32.totalorder %s1395_s17, %s976_s9  ;;  %s1115_s18 = smov [#allocation7]  }
 0x2fe   : > { %753 = vst.msk [vmem:[%s1384_s19 + $0x4] sm:$0xf] %vm450_vm2, %v478_v35  ;;  %s980_s14 = sshll.u32 %s1115_s18, 4  ;;  %s981_s14 = int_to_ptr.vmem [resolvable:$false] %s980_s14 }
 0x2ff   : > { %p978_p0 = pnand %p977_p11, %p1251_p10  ;;  %s982_s3 = scalar_lea.vmem %s981_s14, 512 }
 0x300   : > { %p983_p9 = scmp.lt.s32.totalorder %s1395_s17, %s981_s14  ;;  %p984_p1 = scmp.lt.s32.totalorder %s982_s3, %s976_s9 }
 0x301   : > { %v493_v36 = vpop.permute.xlu1 %492  ;;  %p979_p5 = pneg %p978_p0 }
 0x302   : > { %756 = vst.msk [vmem:[%s1384_s19 + $0x8] sm:$0xf] %vm450_vm2, %v493_v36  ;;  %p985_p2 = por %p984_p1, %p983_p9 }
 0x304   : > { %p986_p7 = pnand %p985_p2, %p979_p5 }
 0x305   : > { %v468_v37 = vpop.permute.xlu1 %467 }
 0x306   : > { %751 = vst.msk [vmem:[%s1332_s8 + $0x4] sm:$0xf] %vm450_vm2, %v468_v37 }
 0x309   : > { %v483_v38 = vpop.permute.xlu1 %482 }
 0x30a   : > { %754 = vst.msk [vmem:[%s1332_s8 + $0x8] sm:$0xf] %vm450_vm2, %v483_v38 }
 0x30b   : > { %989 = shalt.err (!%p986_p7)
}
 0x30c   : > { %s990_s8 = scalar_lea.hbm %s1401_s11, 256  ;;  %s994_s18 = scalar_lea.hbm %s1500_s5, 512 }
 0x30d   : > { %p991_p3 = scmp.ne.s32.totalorder %s1401_s11, %s990_s8  ;;  %p995_p6 = scmp.lt.u32.totalorder %s1401_s11, %s1500_s5 }
 0x30e   : > { %p996_p8 = scmp.lt.u32.totalorder %s994_s18, %s990_s8  ;;  %p998_p11 = scmp.lt.u32.totalorder %s990_s8, %s1401_s11 }
 0x30f   : > { %p992_p4 = pnand %p991_p3, %p1251_p10 }
 0x310   : > { %p997_p12 = por %p996_p8, %p995_p6 }
 0x311   : > { %p993_p13 = pneg %p992_p4 }
 0x312   : > { %p999_p0 = por %p998_p11, %p997_p12 }
 0x314   : > { %p1000_p5 = pnand %p999_p0, %p993_p13 }
 0x316   : > { %1003 = shalt.err (!%p1000_p5)
}
 0x317   : > { %s1525_s3 = smov 64   ;;  %s1526_s12 = sshll.u32 %s1384_s19, 4  ;;  %v508_v39 = vpop.permute.xlu1 %507  ;;  %s1435_s12 = int_to_ptr.vmem [resolvable:$true] %s1526_s12 }
 0x318   : > { %793 = dma.vmem_to_hbm [thread:$0]  (%p1251_p10), %s1395_s17, 256, %s1401_s11, %s513_s16, %s1525_s3, %s1525_s3, %s1114_s30  }
 0x319   : > { %s1441_s13 = scalar_lea.hbm %s1502_s7, %s1342_s20  ;;  %759 = vst.msk [vmem:[%s1384_s19 + $0xc] sm:$0xf] %vm450_vm2, %v508_v39  ;;  %s1004_s15 = scalar_lea.vmem %s1435_s12, 256 }
 0x31a   : > { %p1005_p9 = scmp.ne.s32.totalorder %s1435_s12, %s1004_s15  ;;  %s1116_s17 = smov [#allocation10]  }
 0x31b   : > { %s1008_s11 = sshll.u32 %s1116_s17, 4  ;;  %s1009_s11 = int_to_ptr.vmem [resolvable:$false] %s1008_s11 }
 0x31c   : > { %p1006_p1 = pnand %p1005_p9, %p1251_p10  ;;  %s1010_s16 = scalar_lea.vmem %s1009_s11, 512 }
 0x31d   : > { %p1011_p7 = scmp.lt.s32.totalorder %s1435_s12, %s1009_s11  ;;  %p1012_p3 = scmp.lt.s32.totalorder %s1010_s16, %s1004_s15 }
 0x31e   : > { %p1007_p2 = pneg %p1006_p1 }
 0x31f   : > { %p1013_p4 = por %p1012_p3, %p1011_p7 }
 0x321   : > { %p1014_p13 = pnand %p1013_p4, %p1007_p2 }
 0x323   : > { %1017 = shalt.err (!%p1014_p13)
}
 0x324   : > { %s1018_s20 = scalar_lea.hbm %s1441_s13, 256  ;;  %s1022_s18 = scalar_lea.hbm %s1502_s7, 512 }
 0x325   : > { %p1019_p6 = scmp.ne.s32.totalorder %s1441_s13, %s1018_s20  ;;  %p1023_p11 = scmp.lt.u32.totalorder %s1441_s13, %s1502_s7 }
 0x326   : > { %p1024_p0 = scmp.lt.u32.totalorder %s1022_s18, %s1018_s20  ;;  %p1026_p9 = scmp.lt.u32.totalorder %s1018_s20, %s1441_s13 }
 0x327   : > { %p1020_p8 = pnand %p1019_p6, %p1251_p10 }
 0x328   : > { %p1025_p5 = por %p1024_p0, %p1023_p11 }
 0x329   : > { %p1021_p12 = pneg %p1020_p8 }
 0x32a   : > { %p1027_p1 = por %p1026_p9, %p1025_p5 }
 0x32c   : > { %p1028_p2 = pnand %p1027_p1, %p1021_p12 }
 0x32e   : > { %1031 = shalt.err (!%p1028_p2)
}
 0x32f   : > { %795 = dma.vmem_to_hbm [thread:$0]  (%p1251_p10), %s1435_s12, 256, %s1441_s13, %s1356_s27, %s1525_s3, %s1525_s3, %s1114_s30  }
 0x330 PF: > { %s586_s8 = sand.u32 1, %s1074_s24   ;;  %p1527_p7 = scmp.ne.s32.totalorder %s1512_s10, 0 }
 0x331   : > { %p1528_p3 = scmp.ge.s32.totalorder %s1094_s29, 2  ;;  %s587_s15 = scalar_lea.sflag [#allocation4], %s586_s8 }
 0x333   : > { %p808_p4 = pnand %p1528_p3, %p1527_p7 }
 0x335   : > { %1065 = dma.done.wait (!%p808_p4), %s587_s15, 256  }
 0x336   : > { %1067 = vsyncadd (!%p808_p4), %s587_s15, 4294967040  ;;  %s1529_s21 = sadd.s32 4294967294, %s1094_s29  }
 0x337   : > { %s595_s17 = sand.u32 1, %s1529_s21  }
 0x338   : > { %s596_s11 = scalar_lea.sflag [#allocation9], %s595_s17 }
 0x339   : > { %1069 = dma.done.wait (!%p808_p4), %s596_s11, 512  }
 0x33a   : > { %1071 = vsyncadd (!%p808_p4), %s596_s11, 4294966784  ;;  %s28_s29 = sadd.s32 1, %s1094_s29   ;;  %s1530_s30 = sld [smem:[#allocation15_spill]] }
 0x33b   : > { %p25_p10 = scmp.ge.s32.totalorder %s28_s29, 4   ;;  %s1531_s24 = smov %s1078_s25 }
 0x33c   : > { %s1532_s25 = smov %s1082_s26  ;;  %s1533_s26 = smov %s1260_s23 }
 0x33d   : > { %s1534_s27 = smov %s1090_s28  ;;  %27 = sbr.rel (!%p25_p10) target bundleno = 11 (0xb), region = 130 }
 0x340   : > { %s1535_s28 = smov %s1530_s30 }
 0x344   :  { %610 = vsyncpa [#allocation3], 1 }
 0x345   :  { %612 = vsyncpa [#allocation3 + $0x1], 1 }
 0x346   :  { %613 = vsyncpa [#allocation6], 1 }
 0x347   :  { %614 = vsyncpa [#allocation4], 1 }
 0x348   :  { %616 = vsyncpa [#allocation4 + $0x1], 1 }
 0x349   :  { %617 = vsyncpa [#allocation9], 1 }
 0x34a   :  { %619 = vsyncpa [#allocation9 + $0x1], 1 }

</bundles_post_ra>
